<compile_context>
chip_gen: v6e
topology: v6e:2x2x1
jax: 0.10.0
libtpu: 0.0.40
codegen_flags: <defaults>
</compile_context>

<pallas_src>
import jax
import jax.numpy as jnp
from jax.experimental import pallas as pl
from jax.experimental.pallas import tpu as pltpu

INPUT_DIM = 1
OUTPUT_DIM = 1

LANE = 128            # vreg lane width
SUBLANE = 8           # f32 sublane count
MAX_BLOCK_ROWS = 4096  # (4096, 128) f32 = 2 MiB per block (good on v5e/v6e/v7x)


def _round_up(a, b):
    return ((a + b - 1) // b) * b


def _linear_kernel(x_ref, w_ref, b_ref, o_ref):
    # Scalar weight / bias live in SMEM; folded into the VPU multiply-add.
    w = w_ref[0, 0]
    b = b_ref[0, 0]
    # Compute in f32 (upcast covers bf16 inputs on v5e, which has no bf16 VALU).
    x = x_ref[...].astype(jnp.float32)
    o_ref[...] = (x * w + b).astype(o_ref.dtype)


@jax.jit
def linear_forward(x, w, b):
    """Equivalent of nn.Linear(1, 1): x (N, 1), w (1, 1), b (1,) -> (N, 1)."""
    n, in_dim = x.shape
    out_dim = w.shape[1]
    assert in_dim == INPUT_DIM and out_dim == OUTPUT_DIM
    orig_dtype = x.dtype

    # ---- Lane-dense layout: view the N scalars as a (rows, 128) slab. ----
    rows = pl.cdiv(n, LANE)
    padded_n = rows * LANE

    x_flat = x.reshape(-1)                      # free (metadata only)
    if padded_n != n:
        # Tiny pad to the next lane multiple. allow_input_fusion lets XLA fuse
        # this producer into the pallas_call input DMA (no materialized copy).
        x_flat = jnp.pad(x_flat, (0, padded_n - n))
    x2d = x_flat.reshape(rows, LANE)            # free when no pad was needed

    # Scalar params as (1, 1) SMEM operands.
    w_smem = w.reshape(1, 1).astype(jnp.float32)
    b_smem = b.reshape(1, 1).astype(jnp.float32)

    # ---- Block selection: big blocks, ragged trailing block, >=2 steps. ----
    if rows < 2 * SUBLANE:
        # Tiny input: a single block equal to the full row extent
        # (satisfies the (8,128) rule via "equal to the full array dim").
        block_rows = rows
    else:
        # At least 2 grid steps (v7x megacore sharding), capped at 2 MiB/block.
        block_rows = min(MAX_BLOCK_ROWS, _round_up(pl.cdiv(rows, 2), SUBLANE))
    grid = (pl.cdiv(rows, block_rows),)

    out2d = pl.pallas_call(
        _linear_kernel,
        out_shape=jax.ShapeDtypeStruct((rows, LANE), orig_dtype),
        grid=grid,
        in_specs=[
            pl.BlockSpec((block_rows, LANE), lambda i: (i, 0)),      # x tile
            pl.BlockSpec((1, 1), lambda i: (0, 0),
                         memory_space=pltpu.SMEM),                   # w scalar
            pl.BlockSpec((1, 1), lambda i: (0, 0),
                         memory_space=pltpu.SMEM),                   # b scalar
        ],
        out_specs=pl.BlockSpec((block_rows, LANE), lambda i: (i, 0)),
        compiler_params=pltpu.CompilerParams(
            dimension_semantics=("parallel",),   # shard batch tiles across TCs
            vmem_limit_bytes=40 << 20,           # explicit; safe on v5e/v6e/v7x
            allow_input_fusion=[True, False, False],
        ),
    )(x2d, w_smem, b_smem)

    if padded_n == n:
        # Lane-aligned N: pure metadata reshape, zero extra HBM traffic.
        return out2d.reshape(n, out_dim)
    # Lane-unaligned N: drop the padded tail (padded rows evaluate to b).
    # This slice is the only remaining extra HBM pass, and only in this case.
    return out2d.reshape(-1)[:n].reshape(n, out_dim)


if __name__ == "__main__":
    key = jax.random.PRNGKey(0)
    kx, kw, kb, kx2, kx3 = jax.random.split(key, 5)

    # Deterministic PyTorch-style init: uniform(-1/sqrt(in), 1/sqrt(in)).
    bound = 1.0 / (INPUT_DIM ** 0.5)
    w = jax.random.uniform(
        kw, (INPUT_DIM, OUTPUT_DIM), dtype=jnp.float32, minval=-bound, maxval=bound
    )
    b = jax.random.uniform(
        kb, (OUTPUT_DIM,), dtype=jnp.float32, minval=-bound, maxval=bound
    )

    # Small demo batch matching the module's forward (N, input_dim=1).
    N = 8
    x = jax.random.normal(kx, (N, INPUT_DIM), dtype=jnp.float32)
    out = linear_forward(x, w, b)
    jax.block_until_ready(out)
    ref = x @ w + b.reshape(1, OUTPUT_DIM)
    assert out.shape == (N, OUTPUT_DIM)
    assert jnp.allclose(out, ref, atol=1e-5, rtol=1e-5)

    # Lane-aligned N: exercises the zero-copy path (no pad, no tail slice)
    # and the >=2-step parallel grid.
    N2 = 4096
    x2 = jax.random.normal(kx2, (N2, INPUT_DIM), dtype=jnp.float32)
    out2 = linear_forward(x2, w, b)
    jax.block_until_ready(out2)
    ref2 = x2 @ w + b.reshape(1, OUTPUT_DIM)
    assert out2.shape == (N2, OUTPUT_DIM)
    assert jnp.allclose(out2, ref2, atol=1e-5, rtol=1e-5)

    # Lane-unaligned N: exercises fused pad + ragged (masked) trailing block.
    N3 = 3000
    x3 = jax.random.normal(kx3, (N3, INPUT_DIM), dtype=jnp.float32)
    out3 = linear_forward(x3, w, b)
    jax.block_until_ready(out3)
    ref3 = x3 @ w + b.reshape(1, OUTPUT_DIM)
    assert out3.shape == (N3, OUTPUT_DIM)
    assert jnp.allclose(out3, ref3, atol=1e-5, rtol=1e-5)

    print("KERNEL_OK")
</pallas_src>

<mosaic_0001>
module attributes {stable_mosaic.version = 11 : i64} {
  func.func @_linear_kernel(%arg0: i32, %arg1: memref<1x128xf32, #tpu.memory_space<vmem>>, %arg2: memref<1x1xf32, #tpu.memory_space<smem>>, %arg3: memref<1x1xf32, #tpu.memory_space<smem>>, %arg4: memref<1x128xf32, #tpu.memory_space<vmem>>) attributes {dimension_semantics = [#tpu.dimension_semantics<parallel>], iteration_bounds = array<i64: 1>, scalar_prefetch = 0 : i64, scratch_operands = 0 : i64, tpu.core_type = #tpu.core_type<tc>, window_params = [{transform_indices = @transform_0, window_bounds = array<i64: 1, 128>}, {transform_indices = @transform_1, window_bounds = array<i64: 1, 1>}, {transform_indices = @transform_2, window_bounds = array<i64: 1, 1>}, {transform_indices = @transform_3, window_bounds = array<i64: 1, 128>}]} {
    %c0 = arith.constant 0 : index
    %c0_0 = arith.constant 0 : index
    %0 = memref.load %arg2[%c0, %c0_0] : memref<1x1xf32, #tpu.memory_space<smem>>
    %c0_1 = arith.constant 0 : index
    %c0_2 = arith.constant 0 : index
    %1 = memref.load %arg3[%c0_1, %c0_2] : memref<1x1xf32, #tpu.memory_space<smem>>
    %c0_3 = arith.constant 0 : index
    %c0_4 = arith.constant 0 : index
    %2 = vector.load %arg1[%c0_3, %c0_4] : memref<1x128xf32, #tpu.memory_space<vmem>>, vector<1x128xf32>
    %3 = vector.broadcast %0 : f32 to vector<1x128xf32>
    %4 = arith.mulf %2, %3 : vector<1x128xf32>
    %5 = vector.broadcast %1 : f32 to vector<1x128xf32>
    %6 = arith.addf %4, %5 : vector<1x128xf32>
    %c0_5 = arith.constant 0 : index
    %c0_6 = arith.constant 0 : index
    %7 = vector.load %arg4[%c0_5, %c0_6] : memref<1x128xf32, #tpu.memory_space<vmem>>, vector<1x128xf32>
    tpu.vector_store %arg4[%c0_5, %c0_6], %6 {strides = array<i32>} : memref<1x128xf32, #tpu.memory_space<vmem>>, vector<1x128xf32>,
    return
  }
  func.func @transform_0(%arg0: i32) -> (i32, i32) {
    %c0_i32 = arith.constant 0 : i32
    %c0_i32_0 = arith.constant 0 : i32
    return %arg0, %c0_i32 : i32, i32
  }
  func.func @transform_1(%arg0: i32) -> (i32, i32) {
    %c0_i32 = arith.constant 0 : i32
    %c0_i32_0 = arith.constant 0 : i32
    %c0_i32_1 = arith.constant 0 : i32
    return %c0_i32, %c0_i32_0 : i32, i32
  }
  func.func @transform_2(%arg0: i32) -> (i32, i32) {
    %c0_i32 = arith.constant 0 : i32
    %c0_i32_0 = arith.constant 0 : i32
    %c0_i32_1 = arith.constant 0 : i32
    return %c0_i32, %c0_i32_0 : i32, i32
  }
  func.func @transform_3(%arg0: i32) -> (i32, i32) {
    %c0_i32 = arith.constant 0 : i32
    %c0_i32_0 = arith.constant 0 : i32
    return %arg0, %c0_i32 : i32, i32
  }
}

</mosaic_0001>

<bundles_post_ra>
// kernel: linear_forward.2
= control target key start
LH: loop header
LB: loop body
LE: loop exit
PB: predicated region body
PF: predicated region fallthrough
CT: control target
= control target key end

     0   :  { %s78_s0 = inlined_call_operand.<no memory space> [shape: f32[1,1], index: 0, kind: input, shape index: {}]   ;;  %s79_s1 = inlined_call_operand.<no memory space> [shape: f32[1,1], index: 1, kind: input, shape index: {}]   ;;  %s80_s2 = inlined_call_operand.vmem [shape: f32[8], index: 2, kind: input, shape index: {}]   ;;  %s81_s3 = inlined_call_operand.<no memory space> [shape: f32[], index: 3, kind: input, shape index: {}]   ;;  %s82_s4 = inlined_call_operand.vmem [shape: f32[1,128], index: 4, kind: output, shape index: {}]  }
   0x1   :  { %v9_v0 = vstv %s81_s3 }
   0x2   :  { %v18_v1 = vld [vmem:[%s80_s2] sm:$0x1]  ;;  %v19_v2 = vlaneseq  ;;  %v29_v4 = vstv %s78_s0  ;;  %v31_v6 = vstv %s79_s1 }
   0x4   :  { %vm21_vm0 = vcmp.lt.s32.totalorder %v19_v2, 8 }
   0x5   :  { %v22_v3 = vsel %vm21_vm0, %v18_v1, %v9_v0 }
   0x6   :  { %25 = vst [vmem:[#allocation9] sm:$0x1] %v22_v3 }
   0xd   :  { %v28_v5 = vld [vmem:[#allocation9] sm:$0x1] }
   0xe   :  { %v30_v7 = vmul.f32 %v29_v4, %v28_v5 }
  0x10   :  { %v32_v8 = vadd.f32 %v31_v6, %v30_v7 }
  0x12   :  { %33 = vst [vmem:[%s82_s4] sm:$0x1] %v32_v8 }

</bundles_post_ra>
